<compile_context>
chip_gen: v7x
topology: tpu7x:2x2x1
jax: 0.10.0
libtpu: 0.0.40
codegen_flags: <defaults>
</compile_context>

<pallas_src>
import functools
import math

import jax
import jax.numpy as jnp
from jax import lax
from jax.experimental import pallas as pl
from jax.experimental.pallas import tpu as pltpu

LANES = 128
SUBLANES = 8
CHUNK_ROWS = 128                        # 128x128 f32 chunk = 16 vregs/operand
TARGET_BLOCK_BYTES = 4 * 1024 * 1024    # ~4 MiB per input per grid step
TINY_N = 1 << 16                        # below this, plain XLA wins


def _cdiv(a, b):
    return -(-a // b)


def _tpu_device_kind():
    try:
        return jax.devices()[0].device_kind.lower()
    except Exception:
        return ""


def _dice_sums_kernel(p_ref, t_ref, o_ref, *, block_rows, chunk_rows,
                      blocks_per_split, total_rows, may_mask, unroll):
    """Accumulates (sum(p*t), sum(p+t)) into this split's resident (2,8,128)
    output block.  Grid axis 1 (j) is the reduction axis."""
    s = pl.program_id(0)
    j = pl.program_id(1)

    @pl.when(j == 0)
    def _():
        o_ref[...] = jnp.zeros_like(o_ref)

    nchunks = block_rows // chunk_rows
    groups = chunk_rows // SUBLANES
    # Logical (unclamped) first row of this block; decides masking.
    block_row_start = (s * blocks_per_split + j) * block_rows
    valid_rows = total_rows - block_row_start   # may be <=0 or > block_rows

    zeros = jnp.zeros((SUBLANES, LANES), jnp.float32)

    def accumulate(p, t, acc):
        acc_pt, acc_sum = acc
        pr = p.reshape(groups, SUBLANES, LANES)
        tr = t.reshape(groups, SUBLANES, LANES)
        # Pure VPU vreg adds: (groups,8,128) -> (8,128); no cross-lane work.
        acc_pt = acc_pt + jnp.sum(pr * tr, axis=0)
        acc_sum = acc_sum + jnp.sum(pr + tr, axis=0)
        return acc_pt, acc_sum

    def flush(acc):
        acc_pt, acc_sum = acc
        o_ref[0, :, :] += acc_pt
        o_ref[1, :, :] += acc_sum

    def run_unmasked():
        def body(c, acc):
            r0 = pl.multiple_of(c * chunk_rows, chunk_rows)
            p = p_ref[pl.ds(r0, chunk_rows), :].astype(jnp.float32)
            t = t_ref[pl.ds(r0, chunk_rows), :].astype(jnp.float32)
            return accumulate(p, t, acc)
        flush(lax.fori_loop(0, nchunks, body, (zeros, zeros), unroll=unroll))

    if may_mask:
        is_full = valid_rows >= block_rows

        @pl.when(is_full)
        def _():
            run_unmasked()

        @pl.when(jnp.logical_not(is_full))
        def _():
            # Boundary / clamped out-of-range block: mask rows >= valid_rows.
            # Iota hoisted out of the chunk loop; mask is applied to p and t
            # BEFORE the multiply so unspecified padding never reaches the sums.
            row_iota = lax.broadcasted_iota(jnp.int32, (chunk_rows, LANES), 0)

            def body(c, acc):
                r0 = pl.multiple_of(c * chunk_rows, chunk_rows)
                keep = (row_iota + r0) < valid_rows
                p = jnp.where(
                    keep, p_ref[pl.ds(r0, chunk_rows), :].astype(jnp.float32), 0.0)
                t = jnp.where(
                    keep, t_ref[pl.ds(r0, chunk_rows), :].astype(jnp.float32), 0.0)
                return accumulate(p, t, acc)

            flush(lax.fori_loop(0, nchunks, body, (zeros, zeros), unroll=unroll))
    else:
        run_unmasked()


def _dice_from_sums(intersection, total, smooth):
    smooth_f = jnp.float32(smooth)
    dice = (2.0 * intersection + smooth_f) / (total + smooth_f)
    return (1.0 - dice).astype(jnp.float32)


def _dice_loss_xla(preds, targets, smooth=1.0):
    p = preds.reshape(-1).astype(jnp.float32)
    t = targets.reshape(-1).astype(jnp.float32)
    return _dice_from_sums(jnp.sum(p * t), jnp.sum(p) + jnp.sum(t), smooth)


def dice_loss(preds, targets, smooth=1.0, *, force_kernel=False):
    """Pallas implementation of DiceLoss.forward (returns a scalar f32)."""
    assert preds.shape == targets.shape
    n = math.prod(preds.shape)
    if n == 0:
        return jnp.float32(0.0)     # dice = smooth/smooth = 1 -> loss = 0

    # Tiny inputs: a fused XLA reduction beats the fixed pallas_call cost.
    if n < TINY_N and not force_kernel:
        return _dice_loss_xla(preds, targets, smooth)

    p_flat = preds.reshape(-1)
    t_flat = targets.reshape(-1)

    n_main = (n // LANES) * LANES
    rows = n_main // LANES
    if rows < SUBLANES:                 # not even one (8,128) tile of data
        return _dice_loss_xla(preds, targets, smooth)

    if n_main == n:
        p2d = p_flat.reshape(rows, LANES)   # free view, no HBM copy
        t2d = t_flat.reshape(rows, LANES)
    else:
        # TODO(synk): this 128-aligned prefix slice is one extra HBM copy of
        # each input; a fully zero-copy path would need 1-D element-granular
        # masking inside the kernel.
        p2d = p_flat[:n_main].reshape(rows, LANES)
        t2d = t_flat[:n_main].reshape(rows, LANES)

    p_isz = jnp.dtype(preds.dtype).itemsize
    t_isz = jnp.dtype(targets.dtype).itemsize

    # dtype-aware block sizing: keep the per-step DMA ~TARGET_BLOCK_BYTES.
    target_rows = max(CHUNK_ROWS,
                      (TARGET_BLOCK_BYTES // (LANES * max(p_isz, 1)))
                      // CHUNK_ROWS * CHUNK_ROWS)
    block_rows = max(SUBLANES, min(target_rows, (rows // SUBLANES) * SUBLANES))
    chunk_rows = math.gcd(block_rows, CHUNK_ROWS)   # multiple of 8, divides block
    num_blocks = _cdiv(rows, block_rows)

    kind = _tpu_device_kind()
    is_v7 = "v7" in kind
    nsplit = min(2 if is_v7 else 1, num_blocks)     # 1 TC on v5e/v6e
    n_buffers = 3 if is_v7 else 2                   # deeper pipeline on v7x
    blocks_per_split = _cdiv(num_blocks, nsplit)
    # TODO(synk): with nsplit=2 and an odd block count one split re-reads (and
    # fully masks) a clamped duplicate block; perfect balance needs a
    # prefetch-driven index_map.
    may_mask = (nsplit * blocks_per_split * block_rows) != rows
    if rows % block_rows != 0:
        assert may_mask                              # partial block must mask
    unroll = max(1, min(4, block_rows // chunk_rows))

    def in_index_map(s, j):
        b = s * blocks_per_split + j
        # Out-of-range blocks clamp onto the last real block; the kernel masks
        # them to zero via valid_rows <= 0.
        return (jnp.minimum(b, num_blocks - 1), 0)

    def make_in_spec():
        if n_buffers > 2:
            try:
                return pl.BlockSpec((block_rows, LANES), in_index_map,
                                    pipeline_mode=pl.Buffered(n_buffers))
            except TypeError:       # older jax without pipeline_mode
                pass
        return pl.BlockSpec((block_rows, LANES), in_index_map)

    kernel = functools.partial(
        _dice_sums_kernel,
        block_rows=block_rows, chunk_rows=chunk_rows,
        blocks_per_split=blocks_per_split, total_rows=rows,
        may_mask=may_mask, unroll=unroll)

    # VMEM limit derived from the actual double/triple-buffered footprint.
    block_bytes = block_rows * LANES * (p_isz + t_isz)
    vmem_limit = int(max(16 * 1024 * 1024,
                         n_buffers * block_bytes + 8 * 1024 * 1024))

    if nsplit > 1:
        dim_sem = (getattr(pltpu, "CORE_PARALLEL", "parallel"), "arbitrary")
    else:
        dim_sem = ("arbitrary", "arbitrary")

    cost = pl.CostEstimate(
        flops=4 * n_main,
        transcendentals=0,
        bytes_accessed=n_main * (p_isz + t_isz)
        + nsplit * 2 * SUBLANES * LANES * 4)

    partials = pl.pallas_call(
        kernel,
        out_shape=jax.ShapeDtypeStruct((nsplit, 2, SUBLANES, LANES), jnp.float32),
        grid_spec=pltpu.PrefetchScalarGridSpec(
            num_scalar_prefetch=0,
            grid=(nsplit, blocks_per_split),
            in_specs=[make_in_spec(), make_in_spec()],
            out_specs=pl.BlockSpec((None, 2, SUBLANES, LANES),
                                   lambda s, j: (s, 0, 0, 0)),
        ),
        compiler_params=pltpu.CompilerParams(
            dimension_semantics=dim_sem,
            vmem_limit_bytes=vmem_limit,
        ),
        cost_estimate=cost,
    )(p2d, t2d)

    # Tiny epilogue in plain JAX: combine per-split partials (+ <128-elem tail).
    intersection = jnp.sum(partials[:, 0])
    total = jnp.sum(partials[:, 1])             # sum(p) + sum(t) over prefix
    if n_main != n:
        p_tail = p_flat[n_main:].astype(jnp.float32)
        t_tail = t_flat[n_main:].astype(jnp.float32)
        intersection = intersection + jnp.sum(p_tail * t_tail)
        total = total + jnp.sum(p_tail) + jnp.sum(t_tail)

    return _dice_from_sums(intersection, total, smooth)


if __name__ == "__main__":
    key = jax.random.PRNGKey(0)
    k1, k2, k3, k4 = jax.random.split(key, 4)

    # Segmentation-style (N, C, H, W) inputs.
    B, C, H, W = 2, 4, 16, 16
    preds = jax.nn.sigmoid(jax.random.normal(k1, (B, C, H, W), dtype=jnp.float32))
    targets = (jax.random.uniform(k2, (B, C, H, W)) > 0.5).astype(jnp.float32)

    loss = jax.block_until_ready(
        dice_loss(preds, targets, smooth=1.0, force_kernel=True))
    ref = jax.block_until_ready(_dice_loss_xla(preds, targets, 1.0))
    assert jnp.allclose(loss, ref, atol=1e-5, rtol=1e-5), (loss, ref)

    # Second, 128-unaligned shape: exercises the masked boundary block + tail.
    preds2 = jax.nn.sigmoid(
        jax.random.normal(k3, (2, 3, 37, 53), dtype=jnp.float32))
    targets2 = (jax.random.uniform(k4, (2, 3, 37, 53)) > 0.5).astype(jnp.float32)
    loss2 = jax.block_until_ready(
        dice_loss(preds2, targets2, smooth=1.0, force_kernel=True))
    ref2 = jax.block_until_ready(_dice_loss_xla(preds2, targets2, 1.0))
    assert jnp.allclose(loss2, ref2, atol=1e-5, rtol=1e-5), (loss2, ref2)

    print("KERNEL_OK")
</pallas_src>

<mosaic_0001>
module attributes {stable_mosaic.version = 11 : i64} {
  func.func @_dice_sums_kernel(%arg0: i32, %arg1: i32, %arg2: memref<16x128xf32, #tpu.memory_space<vmem>>, %arg3: memref<16x128xf32, #tpu.memory_space<vmem>>, %arg4: memref<1x2x8x128xf32, #tpu.memory_space<vmem>>) attributes {dimension_semantics = [#tpu.dimension_semantics<arbitrary>, #tpu.dimension_semantics<arbitrary>], iteration_bounds = array<i64: 1, 1>, scalar_prefetch = 0 : i64, scratch_operands = 0 : i64, tpu.core_type = #tpu.core_type<tc>, window_params = [{transform_indices = @transform_0, window_bounds = array<i64: 16, 128>}, {transform_indices = @transform_1, window_bounds = array<i64: 16, 128>}, {transform_indices = @transform_2, window_bounds = array<i64: 1, 2, 8, 128>}]} {
    %c0_i32 = arith.constant 0 : i32
    %0 = arith.cmpi eq, %arg1, %c0_i32 : i32
    %1 = arith.extui %0 : i1 to i32
    %c0_i32_0 = arith.constant 0 : i32
    %2 = arith.cmpi ne, %1, %c0_i32_0 : i32
    scf.if %2 {
      %cst_20 = arith.constant 0.000000e+00 : f32
      %30 = vector.broadcast %cst_20 : f32 to vector<2x8x128xf32>
      %c0_21 = arith.constant 0 : index
      %c0_22 = arith.constant 0 : index
      %c0_23 = arith.constant 0 : index
      %c0_24 = arith.constant 0 : index
      %31 = vector.load %arg4[%c0_21, %c0_22, %c0_23, %c0_24] : memref<1x2x8x128xf32, #tpu.memory_space<vmem>>, vector<1x2x8x128xf32>
      %32 = vector.shape_cast %31 : vector<1x2x8x128xf32> to vector<2x8x128xf32>
      %33 = vector.shape_cast %30 : vector<2x8x128xf32> to vector<1x2x8x128xf32>
      tpu.vector_store %arg4[%c0_21, %c0_22, %c0_23, %c0_24], %33 {strides = array<i32>} : memref<1x2x8x128xf32, #tpu.memory_space<vmem>>, vector<1x2x8x128xf32>,
    } else {
    }
    %cst = arith.constant 0.000000e+00 : f32
    %3 = vector.broadcast %cst : f32 to vector<8x128xf32>
    %c0_i32_1 = arith.constant 0 : i32
    %c16_i32 = arith.constant 16 : i32
    %4 = arith.muli %c0_i32_1, %c16_i32 : i32
    %5 = tpu.assume_multiple %4, 16 : i32
    %6 = arith.index_cast %5 : i32 to index
    %c0 = arith.constant 0 : index
    %7 = vector.load %arg2[%6, %c0] : memref<16x128xf32, #tpu.memory_space<vmem>>, vector<16x128xf32>
    %8 = arith.index_cast %5 : i32 to index
    %c0_2 = arith.constant 0 : index
    %9 = vector.load %arg3[%8, %c0_2] : memref<16x128xf32, #tpu.memory_space<vmem>>, vector<16x128xf32>
    %10 = vector.shape_cast %7 : vector<16x128xf32> to vector<2x8x128xf32>
    %11 = vector.shape_cast %9 : vector<16x128xf32> to vector<2x8x128xf32>
    %12 = arith.mulf %10, %11 : vector<2x8x128xf32>
    %cst_3 = arith.constant dense<0.000000e+00> : vector<8x128xf32>
    %13 = vector.multi_reduction <add>, %12, %cst_3 [0] : vector<2x8x128xf32> to vector<8x128xf32>
    %14 = arith.addf %3, %13 : vector<8x128xf32>
    %15 = arith.addf %10, %11 : vector<2x8x128xf32>
    %cst_4 = arith.constant dense<0.000000e+00> : vector<8x128xf32>
    %16 = vector.multi_reduction <add>, %15, %cst_4 [0] : vector<2x8x128xf32> to vector<8x128xf32>
    %17 = arith.addf %3, %16 : vector<8x128xf32>
    %c1_i32 = arith.constant 1 : i32
    %c0_5 = arith.constant 0 : index
    %c0_6 = arith.constant 0 : index
    %c0_7 = arith.constant 0 : index
    %c0_8 = arith.constant 0 : index
    %18 = vector.load %arg4[%c0_5, %c0_6, %c0_7, %c0_8] : memref<1x2x8x128xf32, #tpu.memory_space<vmem>>, vector<1x1x8x128xf32>
    %19 = vector.shape_cast %18 : vector<1x1x8x128xf32> to vector<8x128xf32>
    %20 = arith.addf %19, %14 : vector<8x128xf32>
    %c0_9 = arith.constant 0 : index
    %c0_10 = arith.constant 0 : index
    %c0_11 = arith.constant 0 : index
    %c0_12 = arith.constant 0 : index
    %21 = vector.load %arg4[%c0_9, %c0_10, %c0_11, %c0_12] : memref<1x2x8x128xf32, #tpu.memory_space<vmem>>, vector<1x1x8x128xf32>
    %22 = vector.shape_cast %21 : vector<1x1x8x128xf32> to vector<8x128xf32>
    %23 = vector.shape_cast %20 : vector<8x128xf32> to vector<1x1x8x128xf32>
    tpu.vector_store %arg4[%c0_9, %c0_10, %c0_11, %c0_12], %23 {strides = array<i32>} : memref<1x2x8x128xf32, #tpu.memory_space<vmem>>, vector<1x1x8x128xf32>,
    %c0_13 = arith.constant 0 : index
    %c1 = arith.constant 1 : index
    %c0_14 = arith.constant 0 : index
    %c0_15 = arith.constant 0 : index
    %24 = vector.load %arg4[%c0_13, %c1, %c0_14, %c0_15] : memref<1x2x8x128xf32, #tpu.memory_space<vmem>>, vector<1x1x8x128xf32>
    %25 = vector.shape_cast %24 : vector<1x1x8x128xf32> to vector<8x128xf32>
    %26 = arith.addf %25, %17 : vector<8x128xf32>
    %c0_16 = arith.constant 0 : index
    %c1_17 = arith.constant 1 : index
    %c0_18 = arith.constant 0 : index
    %c0_19 = arith.constant 0 : index
    %27 = vector.load %arg4[%c0_16, %c1_17, %c0_18, %c0_19] : memref<1x2x8x128xf32, #tpu.memory_space<vmem>>, vector<1x1x8x128xf32>
    %28 = vector.shape_cast %27 : vector<1x1x8x128xf32> to vector<8x128xf32>
    %29 = vector.shape_cast %26 : vector<8x128xf32> to vector<1x1x8x128xf32>
    tpu.vector_store %arg4[%c0_16, %c1_17, %c0_18, %c0_19], %29 {strides = array<i32>} : memref<1x2x8x128xf32, #tpu.memory_space<vmem>>, vector<1x1x8x128xf32>,
    return
  }
  func.func @transform_0(%arg0: i32, %arg1: i32) -> (i32, i32) {
    %c1_i32 = arith.constant 1 : i32
    %0 = arith.muli %arg0, %c1_i32 : i32
    %1 = arith.addi %0, %arg1 : i32
    %c0_i32 = arith.constant 0 : i32
    %2 = arith.minsi %1, %c0_i32 : i32
    %c0_i32_0 = arith.constant 0 : i32
    %c0_i32_1 = arith.constant 0 : i32
    return %2, %c0_i32_0 : i32, i32
  }
  func.func @transform_1(%arg0: i32, %arg1: i32) -> (i32, i32) {
    %c1_i32 = arith.constant 1 : i32
    %0 = arith.muli %arg0, %c1_i32 : i32
    %1 = arith.addi %0, %arg1 : i32
    %c0_i32 = arith.constant 0 : i32
    %2 = arith.minsi %1, %c0_i32 : i32
    %c0_i32_0 = arith.constant 0 : i32
    %c0_i32_1 = arith.constant 0 : i32
    return %2, %c0_i32_0 : i32, i32
  }
  func.func @transform_2(%arg0: i32, %arg1: i32) -> (i32, i32, i32, i32) {
    %c0_i32 = arith.constant 0 : i32
    %c0_i32_0 = arith.constant 0 : i32
    %c0_i32_1 = arith.constant 0 : i32
    %c0_i32_2 = arith.constant 0 : i32
    return %arg0, %c0_i32, %c0_i32_0, %c0_i32_1 : i32, i32, i32, i32
  }
}

</mosaic_0001>

<bundles_post_ra>
// kernel: tpu_custom_call.1
= control target key start
LH: loop header
LB: loop body
LE: loop exit
PB: predicated region body
PF: predicated region fallthrough
CT: control target
= control target key end

     0   :  { %7 = vsyncpa [#allocation3], 0  ;;  %s250_s0 = inlined_call_operand.hbm [shape: f32[16,128], index: 0, kind: input, shape index: {}]   ;;  %s251_s1 = inlined_call_operand.hbm [shape: f32[16,128], index: 1, kind: input, shape index: {}]   ;;  %s252_s2 = inlined_call_operand.hbm [shape: f32[1,2,8,128], index: 2, kind: output, shape index: {}]  }
   0x1   :  { %8 = vsyncpa [#allocation6], 0 }
   0x2   :  { %9 = vsyncpa [#allocation4], 0  ;;  %s185_s9 = smov [#allocation2]   ;;  %s113_s13 = scalar_lea.hbm %s250_s0, 256 }
   0x3   :  { %s21_s10 = sshll.u32 %s185_s9, 4  ;;  %p114_p0 = scmp.ne.s32.totalorder %s250_s0, %s113_s13  ;;  %s22_s10 = int_to_ptr.vmem [resolvable:$true] %s21_s10 }
   0x4   :  { %p117_p1 = scmp.lt.u32.totalorder %s113_s13, %s250_s0 }
   0x6   :  { %p119_p2 = pnand %p117_p1, %p114_p0 }
   0x8   :  { %122 = shalt.err (!%p119_p2)
}
   0x9   :  { %s123_s18 = scalar_lea.vmem %s22_s10, 256  ;;  %p128_p4 = scmp.lt.s32.totalorder %s22_s10, %s22_s10 }
   0xa   :  { %p124_p3 = scmp.ne.s32.totalorder %s22_s10, %s123_s18  ;;  %p129_p5 = scmp.lt.s32.totalorder %s123_s18, %s123_s18 }
   0xc   :  { %p130_p6 = por %p129_p5, %p128_p4 }
   0xe   :  { %p131_p7 = pnand %p130_p6, %p124_p3 }
  0x10   :  { %134 = shalt.err (!%p131_p7)
}
  0x11   :  { %s186_s19 = smov 128   ;;  %s187_s20 = smov 8  }
  0x12   :  { %27 = dma.hbm_to_vmem [thread:$0]  %s250_s0, 256, %s22_s10, [#allocation3], %s186_s19, %s186_s19, %s187_s20  }
  0x13   :  { %s188_s23 = smov [#allocation5]   ;;  %s135_s27 = scalar_lea.hbm %s251_s1, 256 }
  0x14   :  { %s39_s24 = sshll.u32 %s188_s23, 4  ;;  %p136_p8 = scmp.ne.s32.totalorder %s251_s1, %s135_s27  ;;  %s40_s24 = int_to_ptr.vmem [resolvable:$true] %s39_s24 }
  0x15   :  { %p139_p9 = scmp.lt.u32.totalorder %s135_s27, %s251_s1 }
  0x17   :  { %p141_p10 = pnand %p139_p9, %p136_p8 }
  0x19   :  { %144 = shalt.err (!%p141_p10)
}
  0x1a   :  { %s145_s4 = scalar_lea.vmem %s40_s24, 256  ;;  %p150_p12 = scmp.lt.s32.totalorder %s40_s24, %s40_s24 }
  0x1b   :  { %p146_p11 = scmp.ne.s32.totalorder %s40_s24, %s145_s4  ;;  %p151_p13 = scmp.lt.s32.totalorder %s145_s4, %s145_s4 }
  0x1d   :  { %p152_p0 = por %p151_p13, %p150_p12 }
  0x1f   :  { %p153_p1 = pnand %p152_p0, %p146_p11 }
  0x21   :  { %156 = shalt.err (!%p153_p1)
}
  0x22   :  { %45 = dma.hbm_to_vmem [thread:$0]  %s251_s1, 256, %s40_s24, [#allocation6], %s186_s19, %s186_s19, %s187_s20  }
  0x23   :  { %179 = dma.done.wait [#allocation3], 256  }
  0x24   :  { %180 = vsyncadd [#allocation3], 4294967040 }
  0x25   :  { %181 = dma.done.wait [#allocation6], 256  }
  0x26   :  { %182 = vsyncadd [#allocation6], 4294967040  ;;  %v66_v0 = vld [vmem:[#allocation2] sm:$0xff]  ;;  %v67_v1 = vld [vmem:[#allocation2 + $0x8] sm:$0xff]  ;;  %s189_s6 = smov [#allocation7]  }
  0x27   :  { %v68_v2 = vld [vmem:[#allocation5] sm:$0xff]  ;;  %v69_v3 = vld [vmem:[#allocation5 + $0x8] sm:$0xff]  ;;  %s90_s7 = sshll.u32 %s189_s6, 4  ;;  %s91_s7 = int_to_ptr.vmem [resolvable:$true] %s90_s7 }
  0x28   :  { %v70_v4 = vmul.f32 %v68_v2, %v66_v0  ;;  %v74_v5 = vadd.f32 %v68_v2, %v66_v0  ;;  %v71_v6 = vmul.f32 %v69_v3, %v67_v1  ;;  %v75_v7 = vadd.f32 %v69_v3, %v67_v1  ;;  %s157_s1 = scalar_lea.vmem %s91_s7, 256  ;;  %p162_p3 = scmp.lt.s32.totalorder %s91_s7, %s91_s7 }
  0x29   :  { %p158_p2 = scmp.ne.s32.totalorder %s91_s7, %s157_s1  ;;  %p163_p4 = scmp.lt.s32.totalorder %s157_s1, %s157_s1 }
  0x2a   :  { %v72_v8 = vadd.f32 %v71_v6, %v70_v4  ;;  %v76_v9 = vadd.f32 %v75_v7, %v74_v5 }
  0x2b   :  { %p164_p5 = por %p163_p4, %p162_p3 }
  0x2c   :  { %80 = vst [vmem:[#allocation7] sm:$0xff] %v72_v8  ;;  %84 = vst [vmem:[#allocation7 + $0x8] sm:$0xff] %v76_v9 }
  0x2d   :  { %p165_p6 = pnand %p164_p5, %p158_p2 }
  0x2f   :  { %168 = shalt.err (!%p165_p6)
}
  0x30   :  { %s169_s10 = scalar_lea.hbm %s252_s2, 256 }
  0x31   :  { %p170_p7 = scmp.ne.s32.totalorder %s252_s2, %s169_s10  ;;  %p173_p8 = scmp.lt.u32.totalorder %s169_s10, %s252_s2 }
  0x33   :  { %p175_p9 = pnand %p173_p8, %p170_p7 }
  0x35   :  { %178 = shalt.err (!%p175_p9)
}
  0x36   :  { %96 = dma.vmem_to_hbm [thread:$0]  %s91_s7, 256, %s252_s2, [#allocation4], %s186_s19, %s186_s19, %s187_s20  }
  0x37   :  { %183 = dma.done.wait [#allocation4], 256  }
  0x38   :  { %184 = vsyncadd [#allocation4], 4294967040 }
  0x39   :  { %100 = vsyncpa [#allocation3], 1 }
  0x3a   :  { %101 = vsyncpa [#allocation6], 1 }
  0x3b   :  { %102 = vsyncpa [#allocation4], 1 }

</bundles_post_ra>
